<compile_context>
chip_gen: v7x
topology: tpu7x:2x2x1
jax: 0.10.0
libtpu: 0.0.40
codegen_flags: <defaults>
</compile_context>

<pallas_src>
import jax
import jax.numpy as jnp
from jax.experimental import pallas as pl
from jax.experimental.pallas import tpu as pltpu

LANES = 128      # vreg lane width: last dim of every tile
SUBLANES = 8     # f32 sublane granularity: second-to-last dim multiple


def _round_up(a, m):
    return ((a + m - 1) // m) * m


def pinn_kernel(w_ref, b_ref, x_ref, o_ref):
    # w_ref, b_ref: (1,) f32 SMEM scalars; x_ref, o_ref: (block_rows, 128) f32 VMEM tiles.
    z = x_ref[...] * w_ref[0] + b_ref[0]            # VPU elementwise, scalar broadcast free
    # Exact sigmoid with a single EUP op: sigmoid(z) = 0.5 * tanh(z/2) + 0.5.
    o_ref[...] = 0.5 * jnp.tanh(0.5 * z) + 0.5


def pinn_forward(x, w, b, *, block_rows=4096, min_pallas_elems=1 << 15,
                 force_pallas=False):
    """x: (N, 1) f32, w: (1, 1) f32, b: (1,) f32 -> (N, 1) f32 == sigmoid(x @ w.T + b)."""
    n = x.shape[0]

    # Tiny inputs: fixed pallas_call dispatch/DMA cost dominates; fused XLA is faster.
    if n < min_pallas_elems and not force_pallas:
        return jax.nn.sigmoid(
            x.astype(jnp.float32) @ w.reshape(1, 1).T.astype(jnp.float32)
            + b.reshape(1).astype(jnp.float32))

    w_s = jnp.asarray(w, jnp.float32).reshape(1)    # SMEM scalar weight
    b_s = jnp.asarray(b, jnp.float32).reshape(1)    # SMEM scalar bias

    # Lane-dense repack: (N, 1) -> (rows, 128). Pad only the sub-128 tail (and
    # only when N isn't already lane-aligned); keep at least one full (8,128) tile.
    flat = x.reshape(-1).astype(jnp.float32)
    rows = _round_up(n, LANES) // LANES
    rows = max(rows, SUBLANES)
    padded_n = rows * LANES
    if padded_n != n:
        flat = jnp.pad(flat, (0, padded_n - n))
    x2d = flat.reshape(rows, LANES)

    # Block rows: multiple of 8 sublanes, capped by block_rows, and chosen so the
    # 1-D "parallel" grid has >= 2 steps whenever possible (both v7x TCs busy).
    # The last grid step may be a partial boundary block; Pallas masks it.
    br = min(block_rows, rows)
    if rows >= 2 * SUBLANES:
        br = min(br, _round_up((rows + 1) // 2, SUBLANES))
    br = max(SUBLANES, (br // SUBLANES) * SUBLANES)
    grid = (pl.cdiv(rows, br),)

    # in + out, double-buffered f32 tiles, plus headroom; stays within physical
    # VMEM on every generation (v5e/v6e: 128 MiB, v7x: 64 MiB).
    dbuf_bytes = 2 * 2 * br * LANES * 4
    vmem_limit = min(max(32 << 20, dbuf_bytes + (4 << 20)), 48 << 20)

    out2d = pl.pallas_call(
        pinn_kernel,
        out_shape=jax.ShapeDtypeStruct((rows, LANES), jnp.float32),
        grid=grid,
        in_specs=[
            pl.BlockSpec(memory_space=pltpu.MemorySpace.SMEM),    # w scalar
            pl.BlockSpec(memory_space=pltpu.MemorySpace.SMEM),    # b scalar
            pl.BlockSpec((br, LANES), lambda i: (i, 0)),          # lane-dense input tile
        ],
        out_specs=pl.BlockSpec((br, LANES), lambda i: (i, 0)),    # lane-dense output tile
        compiler_params=pltpu.CompilerParams(
            dimension_semantics=("parallel",),
            vmem_limit_bytes=vmem_limit),
    )(w_s, b_s, x2d)

    # Undo tail padding (only emitted when N was unaligned) and restore (N, 1).
    out = out2d.reshape(-1)
    if padded_n != n:
        out = out[:n]
    return out.reshape(n, 1)


if __name__ == "__main__":
    key = jax.random.PRNGKey(0)
    kw, kb = jax.random.split(key)

    # nn.Linear(1, 1)-style init: uniform(-1/sqrt(fan_in), 1/sqrt(fan_in)), fan_in = 1.
    w = jax.random.uniform(kw, (1, 1), jnp.float32, minval=-1.0, maxval=1.0)
    b = jax.random.uniform(kb, (1,), jnp.float32, minval=-1.0, maxval=1.0)

    def ref_fn(xx):
        return jax.nn.sigmoid(xx @ w.T + b)

    # 1) The PyTorch script's literal input: tensor([1., 2.]).view(-1, 1).
    x_small = jnp.array([1.0, 2.0], dtype=jnp.float32).reshape(-1, 1)
    out_small = pinn_forward(x_small, w, b, force_pallas=True)
    jax.block_until_ready(out_small)
    assert out_small.shape == (2, 1)
    assert jnp.allclose(out_small, ref_fn(x_small), atol=1e-5, rtol=1e-5)

    # 2) Lane-aligned large input: no pad / no slice, multi-step parallel grid.
    n_big = 1 << 17
    x_big = jax.random.normal(jax.random.PRNGKey(1), (n_big, 1), dtype=jnp.float32)
    out_big = pinn_forward(x_big, w, b)
    jax.block_until_ready(out_big)
    assert out_big.shape == (n_big, 1)
    assert jnp.allclose(out_big, ref_fn(x_big), atol=1e-5, rtol=1e-5)

    # 3) Unaligned input: exercises the sub-128 tail pad + partial boundary block.
    n_odd = 5000
    x_odd = jax.random.normal(jax.random.PRNGKey(2), (n_odd, 1), dtype=jnp.float32)
    out_odd = pinn_forward(x_odd, w, b, force_pallas=True)
    jax.block_until_ready(out_odd)
    assert out_odd.shape == (n_odd, 1)
    assert jnp.allclose(out_odd, ref_fn(x_odd), atol=1e-5, rtol=1e-5)

    print("KERNEL_OK")
</pallas_src>

<mosaic_0001>
module attributes {stable_mosaic.version = 11 : i64} {
  func.func @pinn_kernel(%arg0: i32, %arg1: memref<1xf32, #tpu.memory_space<smem>>, %arg2: memref<1xf32, #tpu.memory_space<smem>>, %arg3: memref<8x128xf32, #tpu.memory_space<vmem>>, %arg4: memref<8x128xf32, #tpu.memory_space<vmem>>) attributes {dimension_semantics = [#tpu.dimension_semantics<parallel>], iteration_bounds = array<i64: 1>, scalar_prefetch = 0 : i64, scratch_operands = 0 : i64, tpu.core_type = #tpu.core_type<tc>, window_params = [{transform_indices = @transform_0, window_bounds = array<i64: 1>}, {transform_indices = @transform_1, window_bounds = array<i64: 1>}, {transform_indices = @transform_2, window_bounds = array<i64: 8, 128>}, {transform_indices = @transform_3, window_bounds = array<i64: 8, 128>}]} {
    %c0 = arith.constant 0 : index
    %c0_0 = arith.constant 0 : index
    %0 = vector.load %arg3[%c0, %c0_0] : memref<8x128xf32, #tpu.memory_space<vmem>>, vector<8x128xf32>
    %c0_1 = arith.constant 0 : index
    %1 = memref.load %arg1[%c0_1] : memref<1xf32, #tpu.memory_space<smem>>
    %2 = vector.broadcast %1 : f32 to vector<8x128xf32>
    %3 = arith.mulf %0, %2 : vector<8x128xf32>
    %c0_2 = arith.constant 0 : index
    %4 = memref.load %arg2[%c0_2] : memref<1xf32, #tpu.memory_space<smem>>
    %5 = vector.broadcast %4 : f32 to vector<8x128xf32>
    %6 = arith.addf %3, %5 : vector<8x128xf32>
    %cst = arith.constant 5.000000e-01 : f32
    %7 = vector.broadcast %cst : f32 to vector<8x128xf32>
    %8 = arith.mulf %7, %6 : vector<8x128xf32>
    %9 = math.tanh %8 : vector<8x128xf32>
    %cst_3 = arith.constant 5.000000e-01 : f32
    %10 = vector.broadcast %cst_3 : f32 to vector<8x128xf32>
    %11 = arith.mulf %10, %9 : vector<8x128xf32>
    %cst_4 = arith.constant 5.000000e-01 : f32
    %12 = vector.broadcast %cst_4 : f32 to vector<8x128xf32>
    %13 = arith.addf %11, %12 : vector<8x128xf32>
    %c0_5 = arith.constant 0 : index
    %c0_6 = arith.constant 0 : index
    %14 = vector.load %arg4[%c0_5, %c0_6] : memref<8x128xf32, #tpu.memory_space<vmem>>, vector<8x128xf32>
    tpu.vector_store %arg4[%c0_5, %c0_6], %13 {strides = array<i32>} : memref<8x128xf32, #tpu.memory_space<vmem>>, vector<8x128xf32>,
    return
  }
  func.func @transform_0(%arg0: i32) -> i32 {
    %c0_i32 = arith.constant 0 : i32
    %c0_i32_0 = arith.constant 0 : i32
    return %c0_i32 : i32
  }
  func.func @transform_1(%arg0: i32) -> i32 {
    %c0_i32 = arith.constant 0 : i32
    %c0_i32_0 = arith.constant 0 : i32
    return %c0_i32 : i32
  }
  func.func @transform_2(%arg0: i32) -> (i32, i32) {
    %c0_i32 = arith.constant 0 : i32
    %c0_i32_0 = arith.constant 0 : i32
    return %arg0, %c0_i32 : i32, i32
  }
  func.func @transform_3(%arg0: i32) -> (i32, i32) {
    %c0_i32 = arith.constant 0 : i32
    %c0_i32_0 = arith.constant 0 : i32
    return %arg0, %c0_i32 : i32, i32
  }
}

</mosaic_0001>

<bundles_post_ra>
// kernel: tpu_custom_call.1
= control target key start
LH: loop header
LB: loop body
LE: loop exit
PB: predicated region body
PF: predicated region fallthrough
CT: control target
= control target key end

     0   :  { %10 = vsyncpa [#allocation5], 0  ;;  %s160_s0 = inlined_call_operand.<no memory space> [shape: f32[1], index: 0, kind: input, shape index: {}]   ;;  %s161_s1 = inlined_call_operand.<no memory space> [shape: f32[1], index: 1, kind: input, shape index: {}]   ;;  %s162_s2 = inlined_call_operand.hbm [shape: f32[8,128], index: 2, kind: input, shape index: {}]   ;;  %s163_s3 = inlined_call_operand.hbm [shape: f32[8,128], index: 3, kind: output, shape index: {}]  }
   0x1   :  { %11 = vsyncpa [#allocation6], 0  ;;  %s108_s12 = smov [#allocation4]   ;;  %s60_s16 = scalar_lea.hbm %s162_s2, 128 }
   0x2   :  { %s22_s13 = sshll.u32 %s108_s12, 4  ;;  %p61_p0 = scmp.ne.s32.totalorder %s162_s2, %s60_s16  ;;  %s23_s13 = int_to_ptr.vmem [resolvable:$true] %s22_s13 }
   0x3   :  { %p64_p1 = scmp.lt.u32.totalorder %s60_s16, %s162_s2 }
   0x5   :  { %p66_p2 = pnand %p64_p1, %p61_p0 }
   0x7   :  { %69 = shalt.err (!%p66_p2)
}
   0x8   :  { %s70_s21 = scalar_lea.vmem %s23_s13, 128  ;;  %p75_p4 = scmp.lt.s32.totalorder %s23_s13, %s23_s13 }
   0x9   :  { %p71_p3 = scmp.ne.s32.totalorder %s23_s13, %s70_s21  ;;  %p76_p5 = scmp.lt.s32.totalorder %s70_s21, %s70_s21 }
   0xb   :  { %p77_p6 = por %p76_p5, %p75_p4 }
   0xd   :  { %p78_p7 = pnand %p77_p6, %p71_p3 }
   0xf   :  { %81 = shalt.err (!%p78_p7)
}
  0x10   :  { %25 = dma.hbm_to_vmem [thread:$0]  %s162_s2, 128, %s23_s13, [#allocation5]  }
  0x11   :  { %104 = dma.done.wait [#allocation5], 128  }
  0x12   :  { %105 = vsyncadd [#allocation5], 4294967168  ;;  %v31_v0 = vstv %s160_s0  ;;  %v29_v1 = vld [vmem:[#allocation4] sm:$0xff]  ;;  %v34_v2 = vstv %s161_s1  ;;  %s109_s28 = smov [#allocation7]  }
  0x13   :  { %v32_v3 = vmul.f32 %v31_v0, %v29_v1  ;;  %s47_s29 = sshll.u32 %s109_s28, 4  ;;  %s48_s29 = int_to_ptr.vmem [resolvable:$true] %s47_s29 }
  0x14   :  { %s82_s2 = scalar_lea.vmem %s48_s29, 128  ;;  %p87_p9 = scmp.lt.s32.totalorder %s48_s29, %s48_s29 }
  0x15   :  { %v35_v4 = vadd.f32 %v34_v2, %v32_v3  ;;  %p83_p8 = scmp.ne.s32.totalorder %s48_s29, %s82_s2  ;;  %p88_p10 = scmp.lt.s32.totalorder %s82_s2, %s82_s2 }
  0x17   :  { %v36_v5 = vmul.f32 0.5, %v35_v4  ;;  %p89_p11 = por %p88_p10, %p87_p9 }
  0x19   :  { %58 = vtanh.f32 %v36_v5  ;;  %p90_p12 = pnand %p89_p11, %p83_p8 }
  0x23   :  { %v59_v6 = vpop.eup %58 }
  0x24   :  { %v38_v7 = vmul.f32 0.5, %v59_v6 }
  0x26   :  { %v39_v8 = vadd.f32 0.5, %v38_v7 }
  0x28   :  { %40 = vst [vmem:[#allocation7] sm:$0xff] %v39_v8 }
  0x29   :  { %93 = shalt.err (!%p90_p12)
}
  0x2a   :  { %s94_s30 = scalar_lea.hbm %s163_s3, 128 }
  0x2b   :  { %p95_p13 = scmp.ne.s32.totalorder %s163_s3, %s94_s30  ;;  %p98_p0 = scmp.lt.u32.totalorder %s94_s30, %s163_s3 }
  0x2d   :  { %p100_p1 = pnand %p98_p0, %p95_p13 }
  0x2f   :  { %103 = shalt.err (!%p100_p1)
}
  0x30   :  { %50 = dma.vmem_to_hbm [thread:$0]  %s48_s29, 128, %s163_s3, [#allocation6]  }
  0x31   :  { %106 = dma.done.wait [#allocation6], 128  }
  0x32   :  { %107 = vsyncadd [#allocation6], 4294967168 }
  0x33   :  { %54 = vsyncpa [#allocation5], 1 }
  0x34   :  { %55 = vsyncpa [#allocation6], 1 }

</bundles_post_ra>
